<compile_context>
chip_gen: v6e
topology: v6e:2x2x1
jax: 0.10.0
libtpu: 0.0.40
codegen_flags: <defaults>
</compile_context>

<pallas_src>
import jax
import jax.numpy as jnp
import numpy as np
from jax.experimental import pallas as pl
from jax.experimental.pallas import tpu as pltpu


def _make_kernel(L, B):
    def kernel(x_ref, t_ref, bias_ref, fcw_ref, s3_ref, b3_ref, out_ref, feat_ref):
        # Per history step: BN1 + Conv1d + bias + BN2, all pre-folded into one
        # band-matrix MXU matmul (B, C_in*Hp) @ (C_in*Hp, C_out*H) + bias row.
        # Results land directly in the fc flatten order (co*H + h) in a shared
        # VMEM feature buffer (rows i*B .. i*B+B-1 for step i).
        for i in range(L):
            feat_ref[i * B:(i + 1) * B, :] = (
                jnp.dot(x_ref[i], t_ref[i], preferred_element_type=jnp.float32)
                + bias_ref[i])

        # Shared fully-connected layer: ONE matmul over all (step, batch) rows,
        # then the per-step output BN (fc bias folded in) + ReLU, fully hoisted,
        # and a single full-tile store.
        score = jnp.dot(feat_ref[...], fcw_ref[...],
                        preferred_element_type=jnp.float32)
        out_ref[...] = jnp.maximum(score * s3_ref[...] + b3_ref[...], 0.0)

    return kernel


def length_aware_conv_transe(hist_feats, params):
    """hist_feats: (hist_len, B, C_in, hidden) float32 -> (hist_len, B, hidden)."""
    (conv_w, conv_b, bn1_s, bn1_b, bn2_s, bn2_b,
     fc_w, fc_b, bn3_s, bn3_b) = params
    L, B, C_in, H = hist_feats.shape
    C_out, _, K = conv_w.shape[1:]
    # PyTorch pad=(K-1)//2 only preserves the length (and hence matches the
    # Linear(hidden*C_out, hidden) input size) for odd K.
    assert K % 2 == 1, "LengthAwareConvTransE requires odd kernel_size"
    pad = (K - 1) // 2
    Hp = H + 2 * pad
    f32 = jnp.float32

    # --- host-side parameter folding (weight-sized work only) -----------------
    # Fold BN1 (per-C_in scale) and BN2 (per-C_out scale) into the conv weights.
    Wf = (conv_w * bn1_s[:, None, :, None] * bn2_s[:, :, None, None]).astype(f32)

    # Band (Toeplitz) matrix: T[l, ci*Hp + p, co*H + h] = Wf[l, co, ci, p - h]
    # when 0 <= p - h < K, else 0.  Column order co*H + h matches the PyTorch
    # flatten of (B, C_out, H), so the conv output is directly fc-ready.
    p_idx = jnp.arange(Hp)[:, None]                     # (Hp, 1)
    h_idx = jnp.arange(H)[None, :]                      # (1, H)
    t_idx = p_idx - h_idx                               # (Hp, H)
    band = ((t_idx >= 0) & (t_idx < K)).astype(f32)
    tc = jnp.clip(t_idx, 0, K - 1)
    Tg = Wf[:, :, :, tc] * band                         # (L, Co, Ci, Hp, H)
    T = jnp.transpose(Tg, (0, 2, 3, 1, 4)).reshape(L, C_in * Hp, C_out * H)

    # Position-dependent bias: the BN1 shift pushed through the conv (it only
    # differs near the zero-padded border), plus conv bias and BN2 shift.
    hpt = jnp.arange(H)[:, None] + jnp.arange(K)[None, :] - pad      # (H, K)
    validw = ((hpt >= 0) & (hpt < H)).astype(f32)                    # (H, K)
    wb1 = conv_w * bn1_b[:, None, :, None]                           # (L, Co, Ci, K)
    b1map = (wb1[:, :, :, None, :] * validw[None, None, None]).sum(axis=(2, 4))
    bias = bn2_s[:, :, None] * (b1map + conv_b[:, :, None]) + bn2_b[:, :, None]
    bias = bias.reshape(L, 1, C_out * H).astype(f32)                 # (L, 1, Co*H)

    # Shared fc weight (transposed for feat @ fc_wT); fc bias folded into the
    # per-step eval BN3 affine, expanded to one row per (step, batch) sample.
    fc_wT = fc_w.T.astype(f32)                                       # (Co*H, H)
    s3e = jnp.repeat(bn3_s, B, axis=0).astype(f32)                   # (L*B, H)
    b3e = jnp.repeat(bn3_s * fc_b[None, :] + bn3_b, B, axis=0).astype(f32)

    # --- data glue: zero-pad the length axis and flatten (C_in, Hp) -----------
    x_flat = jnp.pad(hist_feats, ((0, 0), (0, 0), (0, 0), (pad, pad))) \
                .reshape(L, B, C_in * Hp).astype(f32)                # (L, B, Ci*Hp)

    kernel = _make_kernel(L, B)
    out = pl.pallas_call(
        kernel,
        out_shape=jax.ShapeDtypeStruct((L * B, H), f32),
        scratch_shapes=[pltpu.VMEM((L * B, C_out * H), f32)],
    )(x_flat, T, bias, fc_wT, s3e, b3e)
    return out.reshape(L, B, H)


def reference(x, params):
    """Pure-JAX eval-mode reference matching the PyTorch batch_forward."""
    (conv_w, conv_b, bn1_s, bn1_b, bn2_s, bn2_b,
     fc_w, fc_b, bn3_s, bn3_b) = params
    L, B, C_in, H = x.shape
    C_out, _, K = conv_w.shape[1:]
    pad = (K - 1) // 2
    outs = []
    for i in range(L):
        xi = x[i] * bn1_s[i][None, :, None] + bn1_b[i][None, :, None]
        y = jax.lax.conv_general_dilated(
            xi, conv_w[i], window_strides=(1,), padding=[(pad, pad)],
            dimension_numbers=("NCH", "OIH", "NCH"),
            precision=jax.lax.Precision.HIGHEST)
        y = y + conv_b[i][None, :, None]
        y = y * bn2_s[i][None, :, None] + bn2_b[i][None, :, None]
        feat = y.reshape(B, C_out * H)                      # C-order: co*H + h
        sc = jnp.dot(feat, fc_w.T,
                     precision=jax.lax.Precision.HIGHEST) + fc_b
        sc = sc * bn3_s[i][None, :] + bn3_b[i][None, :]
        outs.append(jnp.maximum(sc, 0.0))
    return jnp.stack(outs)


if __name__ == "__main__":
    hidden, hist_len, C_in, C_out, K, B = 32, 3, 4, 8, 3, 4
    eps = 1e-5
    key = jax.random.PRNGKey(0)
    ks = jax.random.split(key, 16)

    def bn_eval_affine(kg, kb, km, kv, shape):
        gamma = 1.0 + 0.1 * jax.random.normal(kg, shape, jnp.float32)
        beta = 0.1 * jax.random.normal(kb, shape, jnp.float32)
        mean = 0.1 * jax.random.normal(km, shape, jnp.float32)
        var = jax.random.uniform(kv, shape, jnp.float32, minval=0.5, maxval=1.5)
        scale = gamma / jnp.sqrt(var + eps)
        shift = beta - mean * scale
        return scale, shift

    conv_w = 0.3 * jax.random.normal(ks[0], (hist_len, C_out, C_in, K), jnp.float32)
    conv_b = 0.1 * jax.random.normal(ks[1], (hist_len, C_out), jnp.float32)
    bn1_s, bn1_b = bn_eval_affine(ks[2], ks[3], ks[4], ks[5], (hist_len, C_in))
    bn2_s, bn2_b = bn_eval_affine(ks[6], ks[7], ks[8], ks[9], (hist_len, C_out))
    fc_w = (jax.random.normal(ks[10], (hidden, C_out * hidden), jnp.float32)
            / np.sqrt(C_out * hidden).astype(np.float32))
    fc_b = 0.1 * jax.random.normal(ks[11], (hidden,), jnp.float32)
    bn3_s, bn3_b = bn_eval_affine(ks[12], ks[13], ks[14], ks[15], (hist_len, hidden))

    params = (conv_w, conv_b, bn1_s, bn1_b, bn2_s, bn2_b,
              fc_w, fc_b, bn3_s, bn3_b)

    x = jax.random.normal(jax.random.fold_in(key, 123),
                          (hist_len, B, C_in, hidden), jnp.float32)

    out = length_aware_conv_transe(x, params)
    out = jax.block_until_ready(out)

    ref = reference(x, params)
    assert out.shape == (hist_len, B, hidden), out.shape
    err = float(jnp.max(jnp.abs(out - ref)))
    assert err < 2e-3, f"max abs error too large: {err}"
    print("KERNEL_OK")
</pallas_src>

<mosaic_0001>
module attributes {stable_mosaic.version = 11 : i64} {
  func.func @kernel(%arg0: memref<3x4x136xf32, #tpu.memory_space<vmem>>, %arg1: memref<3x136x256xf32, #tpu.memory_space<vmem>>, %arg2: memref<3x1x256xf32, #tpu.memory_space<vmem>>, %arg3: memref<256x32xf32, #tpu.memory_space<vmem>>, %arg4: memref<12x32xf32, #tpu.memory_space<vmem>>, %arg5: memref<12x32xf32, #tpu.memory_space<vmem>>, %arg6: memref<12x32xf32, #tpu.memory_space<vmem>>, %arg7: memref<12x256xf32, #tpu.memory_space<vmem>>) attributes {dimension_semantics = [], scalar_prefetch = 0 : i64, scratch_operands = 1 : i64, tpu.core_type = #tpu.core_type<tc>} {
    %c0 = arith.constant 0 : index
    %c0_0 = arith.constant 0 : index
    %c0_1 = arith.constant 0 : index
    %0 = vector.load %arg0[%c0, %c0_0, %c0_1] : memref<3x4x136xf32, #tpu.memory_space<vmem>>, vector<1x4x136xf32>
    %1 = vector.shape_cast %0 : vector<1x4x136xf32> to vector<4x136xf32>
    %c0_2 = arith.constant 0 : index
    %c0_3 = arith.constant 0 : index
    %c0_4 = arith.constant 0 : index
    %2 = vector.load %arg1[%c0_2, %c0_3, %c0_4] : memref<3x136x256xf32, #tpu.memory_space<vmem>>, vector<1x136x256xf32>
    %3 = vector.shape_cast %2 : vector<1x136x256xf32> to vector<136x256xf32>
    %cst = arith.constant dense<0.000000e+00> : vector<4x256xf32>
    %4 = tpu.matmul %1, %3, %cst {dimension_numbers = #tpu.dot_dimension_numbers<[1], [0], [0], [1], [0, 0, 1, 1], [], []>} : vector<4x136xf32>, vector<136x256xf32>, vector<4x256xf32> -> vector<4x256xf32>
    %c0_5 = arith.constant 0 : index
    %c0_6 = arith.constant 0 : index
    %c0_7 = arith.constant 0 : index
    %5 = vector.load %arg2[%c0_5, %c0_6, %c0_7] : memref<3x1x256xf32, #tpu.memory_space<vmem>>, vector<1x1x256xf32>
    %6 = vector.shape_cast %5 : vector<1x1x256xf32> to vector<1x256xf32>
    %7 = vector.broadcast %6 : vector<1x256xf32> to vector<4x256xf32>
    %8 = arith.addf %4, %7 : vector<4x256xf32>
    %c0_8 = arith.constant 0 : index
    %c0_9 = arith.constant 0 : index
    %9 = vector.load %arg7[%c0_8, %c0_9] : memref<12x256xf32, #tpu.memory_space<vmem>>, vector<4x256xf32>
    tpu.vector_store %arg7[%c0_8, %c0_9], %8 {strides = array<i32>} : memref<12x256xf32, #tpu.memory_space<vmem>>, vector<4x256xf32>,
    %c1 = arith.constant 1 : index
    %c0_10 = arith.constant 0 : index
    %c0_11 = arith.constant 0 : index
    %10 = vector.load %arg0[%c1, %c0_10, %c0_11] : memref<3x4x136xf32, #tpu.memory_space<vmem>>, vector<1x4x136xf32>
    %11 = vector.shape_cast %10 : vector<1x4x136xf32> to vector<4x136xf32>
    %c1_12 = arith.constant 1 : index
    %c0_13 = arith.constant 0 : index
    %c0_14 = arith.constant 0 : index
    %12 = vector.load %arg1[%c1_12, %c0_13, %c0_14] : memref<3x136x256xf32, #tpu.memory_space<vmem>>, vector<1x136x256xf32>
    %13 = vector.shape_cast %12 : vector<1x136x256xf32> to vector<136x256xf32>
    %cst_15 = arith.constant dense<0.000000e+00> : vector<4x256xf32>
    %14 = tpu.matmul %11, %13, %cst_15 {dimension_numbers = #tpu.dot_dimension_numbers<[1], [0], [0], [1], [0, 0, 1, 1], [], []>} : vector<4x136xf32>, vector<136x256xf32>, vector<4x256xf32> -> vector<4x256xf32>
    %c1_16 = arith.constant 1 : index
    %c0_17 = arith.constant 0 : index
    %c0_18 = arith.constant 0 : index
    %15 = vector.load %arg2[%c1_16, %c0_17, %c0_18] : memref<3x1x256xf32, #tpu.memory_space<vmem>>, vector<1x1x256xf32>
    %16 = vector.shape_cast %15 : vector<1x1x256xf32> to vector<1x256xf32>
    %17 = vector.broadcast %16 : vector<1x256xf32> to vector<4x256xf32>
    %18 = arith.addf %14, %17 : vector<4x256xf32>
    %c4 = arith.constant 4 : index
    %c0_19 = arith.constant 0 : index
    %19 = vector.load %arg7[%c4, %c0_19] : memref<12x256xf32, #tpu.memory_space<vmem>>, vector<4x256xf32>
    tpu.vector_store %arg7[%c4, %c0_19], %18 {strides = array<i32>} : memref<12x256xf32, #tpu.memory_space<vmem>>, vector<4x256xf32>,
    %c2 = arith.constant 2 : index
    %c0_20 = arith.constant 0 : index
    %c0_21 = arith.constant 0 : index
    %20 = vector.load %arg0[%c2, %c0_20, %c0_21] : memref<3x4x136xf32, #tpu.memory_space<vmem>>, vector<1x4x136xf32>
    %21 = vector.shape_cast %20 : vector<1x4x136xf32> to vector<4x136xf32>
    %c2_22 = arith.constant 2 : index
    %c0_23 = arith.constant 0 : index
    %c0_24 = arith.constant 0 : index
    %22 = vector.load %arg1[%c2_22, %c0_23, %c0_24] : memref<3x136x256xf32, #tpu.memory_space<vmem>>, vector<1x136x256xf32>
    %23 = vector.shape_cast %22 : vector<1x136x256xf32> to vector<136x256xf32>
    %cst_25 = arith.constant dense<0.000000e+00> : vector<4x256xf32>
    %24 = tpu.matmul %21, %23, %cst_25 {dimension_numbers = #tpu.dot_dimension_numbers<[1], [0], [0], [1], [0, 0, 1, 1], [], []>} : vector<4x136xf32>, vector<136x256xf32>, vector<4x256xf32> -> vector<4x256xf32>
    %c2_26 = arith.constant 2 : index
    %c0_27 = arith.constant 0 : index
    %c0_28 = arith.constant 0 : index
    %25 = vector.load %arg2[%c2_26, %c0_27, %c0_28] : memref<3x1x256xf32, #tpu.memory_space<vmem>>, vector<1x1x256xf32>
    %26 = vector.shape_cast %25 : vector<1x1x256xf32> to vector<1x256xf32>
    %27 = vector.broadcast %26 : vector<1x256xf32> to vector<4x256xf32>
    %28 = arith.addf %24, %27 : vector<4x256xf32>
    %c8 = arith.constant 8 : index
    %c0_29 = arith.constant 0 : index
    %29 = vector.load %arg7[%c8, %c0_29] : memref<12x256xf32, #tpu.memory_space<vmem>>, vector<4x256xf32>
    tpu.vector_store %arg7[%c8, %c0_29], %28 {strides = array<i32>} : memref<12x256xf32, #tpu.memory_space<vmem>>, vector<4x256xf32>,
    %c0_30 = arith.constant 0 : index
    %c0_31 = arith.constant 0 : index
    %30 = vector.load %arg7[%c0_30, %c0_31] : memref<12x256xf32, #tpu.memory_space<vmem>>, vector<12x256xf32>
    %c0_32 = arith.constant 0 : index
    %c0_33 = arith.constant 0 : index
    %31 = vector.load %arg3[%c0_32, %c0_33] : memref<256x32xf32, #tpu.memory_space<vmem>>, vector<256x32xf32>
    %cst_34 = arith.constant dense<0.000000e+00> : vector<12x32xf32>
    %32 = tpu.matmul %30, %31, %cst_34 {dimension_numbers = #tpu.dot_dimension_numbers<[1], [0], [0], [1], [0, 0, 1, 1], [], []>} : vector<12x256xf32>, vector<256x32xf32>, vector<12x32xf32> -> vector<12x32xf32>
    %c0_35 = arith.constant 0 : index
    %c0_36 = arith.constant 0 : index
    %33 = vector.load %arg4[%c0_35, %c0_36] : memref<12x32xf32, #tpu.memory_space<vmem>>, vector<12x32xf32>
    %34 = arith.mulf %32, %33 : vector<12x32xf32>
    %c0_37 = arith.constant 0 : index
    %c0_38 = arith.constant 0 : index
    %35 = vector.load %arg5[%c0_37, %c0_38] : memref<12x32xf32, #tpu.memory_space<vmem>>, vector<12x32xf32>
    %36 = arith.addf %34, %35 : vector<12x32xf32>
    %cst_39 = arith.constant 0.000000e+00 : f32
    %37 = vector.broadcast %cst_39 : f32 to vector<12x32xf32>
    %38 = arith.maximumf %36, %37 : vector<12x32xf32>
    %c0_40 = arith.constant 0 : index
    %c0_41 = arith.constant 0 : index
    %39 = vector.load %arg6[%c0_40, %c0_41] : memref<12x32xf32, #tpu.memory_space<vmem>>, vector<12x32xf32>
    tpu.vector_store %arg6[%c0_40, %c0_41], %38 {strides = array<i32>} : memref<12x32xf32, #tpu.memory_space<vmem>>, vector<12x32xf32>,
    return
  }
}

</mosaic_0001>

<bundles_post_ra>
// kernel: tpu_custom_call.1
= control target key start
LH: loop header
LB: loop body
LE: loop exit
PB: predicated region body
PF: predicated region fallthrough
CT: control target
= control target key end

     0   :  { %11 = vsyncpa [#allocation4], 0  ;;  %s844_s0 = inlined_call_operand.vmem [shape: f32[3,4,136], index: 0, kind: input, shape index: {}]   ;;  %s845_s1 = inlined_call_operand.hbm [shape: f32[3,136,256], index: 1, kind: input, shape index: {}]   ;;  %s846_s2 = inlined_call_operand.vmem [shape: f32[3,1,256], index: 2, kind: input, shape index: {}]   ;;  %s847_s3 = inlined_call_operand.vmem [shape: f32[256,32], index: 3, kind: input, shape index: {}]   ;;  %s848_s4 = inlined_call_operand.vmem [shape: f32[12,32], index: 4, kind: input, shape index: {}]   ;;  %s849_s5 = inlined_call_operand.vmem [shape: f32[12,32], index: 5, kind: input, shape index: {}]   ;;  %s850_s6 = inlined_call_operand.hbm [shape: f32[12,32], index: 6, kind: output, shape index: {}]  }
   0x1   :  { %12 = vsyncpa [#allocation5], 0  ;;  %s663_s21 = smov [#allocation3]  }
   0x2   :  { %s20_s22 = sshll.u32 %s663_s21, 4  ;;  %s21_s22 = int_to_ptr.vmem [resolvable:$true] %s20_s22 }
   0x3   :  { %s627_s23 = scalar_lea.vmem %s21_s22, 13056  ;;  %p632_p1 = scmp.lt.s32.totalorder %s21_s22, %s21_s22 }
   0x4   :  { %p628_p0 = scmp.ne.s32.totalorder %s21_s22, %s627_s23  ;;  %p633_p2 = scmp.lt.s32.totalorder %s627_s23, %s627_s23 }
   0x6   :  { %p634_p3 = por %p633_p2, %p632_p1 }
   0x8   :  { %p635_p4 = pnand %p634_p3, %p628_p0 }
   0xa   :  { %638 = shalt.err (!%p635_p4)
}
   0xb   :  { %s664_s24 = smov 256   ;;  %s665_s25 = smov 16  }
   0xc   :  { %26 = dma.hbm_to_vmem [thread:$0]  %s845_s1, 13056, %s21_s22, [#allocation4], %s664_s24, %s664_s24, %s665_s25  }
   0xd   :  { %659 = dma.done.wait [#allocation4], 13056  }
   0xe   :  { %660 = vsyncadd [#allocation4], 4294954240  ;;  %v70_v0 = vld [vmem:[#allocation3 + $0xf8] sm:$0xff]  ;;  %v197_v1 = vld [vmem:[#allocation3 + $0x208] sm:$0xff]  ;;  %vm87_vm0 = vcmask 64512   ;;  %vm544_vm1 = vcmask 261120  }
   0xf   :  { %v69_v2 = vld [vmem:[#allocation3 + $0xf0] sm:$0xff]  ;;  %90 = vmatprep.subr.mxu0 %v70_v0  ;;  %217 = vmatprep.subr.mxu1 %v197_v1  ;;  %v196_v3 = vld [vmem:[#allocation3 + $0x200] sm:$0xff]  ;;  %v68_v4 = vld [vmem:[#allocation3 + $0xe8] sm:$0xff]  ;;  %s666_s7 = smov [#allocation6]   ;;  %vm546_vm2 = vcmask 257024  }
  0x10   :  { %v195_v5 = vld [vmem:[#allocation3 + $0x1f8] sm:$0xff]  ;;  %91 = vmatpush1.msra.mxu0 %v69_v2  ;;  %218 = vmatpush1.msra.mxu1 %v196_v3  ;;  %v67_v6 = vld [vmem:[#allocation3 + $0xe0] sm:$0xff]  ;;  %v194_v7 = vld [vmem:[#allocation3 + $0x1f0] sm:$0xff]  ;;  %s553_s8 = sshll.u32 %s666_s7, 4  ;;  %s554_s8 = int_to_ptr.vmem [resolvable:$true] %s553_s8 }
  0x11   :  { %v66_v8 = vld [vmem:[#allocation3 + $0xd8] sm:$0xff]  ;;  %92 = vmatprep.subr.mxu0 %v68_v4  ;;  %219 = vmatprep.subr.mxu1 %v195_v5  ;;  %v193_v9 = vld [vmem:[#allocation3 + $0x1e8] sm:$0xff]  ;;  %v65_v10 = vld [vmem:[#allocation3 + $0xd0] sm:$0xff]  ;;  %s639_s9 = scalar_lea.vmem %s554_s8, 256  ;;  %p644_p6 = scmp.lt.s32.totalorder %s554_s8, %s554_s8 }
  0x12   :  { %v192_v11 = vld [vmem:[#allocation3 + $0x1e0] sm:$0xff]  ;;  %93 = vmatpush1.msra.mxu0 %v67_v6  ;;  %220 = vmatpush1.msra.mxu1 %v194_v7  ;;  %v64_v12 = vld [vmem:[#allocation3 + $0xc8] sm:$0xff]  ;;  %v191_v13 = vld [vmem:[#allocation3 + $0x1d8] sm:$0xff]  ;;  %p640_p5 = scmp.ne.s32.totalorder %s554_s8, %s639_s9  ;;  %p645_p7 = scmp.lt.s32.totalorder %s639_s9, %s639_s9 }
  0x13   :  { %94 = vmatprep.subr.mxu0 %v66_v8  ;;  %221 = vmatprep.subr.mxu1 %v193_v9  ;;  %v63_v14 = vld [vmem:[#allocation3 + $0xc0] sm:$0xff]  ;;  %v190_v15 = vld [vmem:[#allocation3 + $0x1d0] sm:$0xff]  ;;  %v62_v16 = vld [vmem:[#allocation3 + $0xb8] sm:$0xff] }
  0x14   :  { %95 = vmatpush1.msra.mxu0 %v65_v10  ;;  %222 = vmatpush1.msra.mxu1 %v192_v11  ;;  %v189_v17 = vld [vmem:[#allocation3 + $0x1c8] sm:$0xff]  ;;  %v61_v18 = vld [vmem:[#allocation3 + $0xb0] sm:$0xff]  ;;  %v188_v19 = vld [vmem:[#allocation3 + $0x1c0] sm:$0xff]  ;;  %p646_p8 = por %p645_p7, %p644_p6 }
  0x15   :  { %96 = vmatprep.subr.mxu0 %v64_v12  ;;  %223 = vmatprep.subr.mxu1 %v191_v13  ;;  %v60_v20 = vld [vmem:[#allocation3 + $0xa8] sm:$0xff]  ;;  %v187_v21 = vld [vmem:[#allocation3 + $0x1b8] sm:$0xff]  ;;  %v59_v22 = vld [vmem:[#allocation3 + $0xa0] sm:$0xff] }
  0x16   :  { %97 = vmatpush1.msra.mxu0 %v63_v14  ;;  %224 = vmatpush1.msra.mxu1 %v190_v15  ;;  %v186_v23 = vld [vmem:[#allocation3 + $0x1b0] sm:$0xff]  ;;  %v58_v24 = vld [vmem:[#allocation3 + $0x98] sm:$0xff]  ;;  %v185_v25 = vld [vmem:[#allocation3 + $0x1a8] sm:$0xff]  ;;  %p647_p9 = pnand %p646_p8, %p640_p5 }
  0x17   :  { %98 = vmatprep.subr.mxu0 %v62_v16  ;;  %225 = vmatprep.subr.mxu1 %v189_v17  ;;  %v57_v26 = vld [vmem:[#allocation3 + $0x90] sm:$0xff]  ;;  %v184_v27 = vld [vmem:[#allocation3 + $0x1a0] sm:$0xff]  ;;  %v56_v28 = vld [vmem:[#allocation3 + $0x88] sm:$0xff] }
  0x18   :  { %99 = vmatpush1.msra.mxu0 %v61_v18  ;;  %226 = vmatpush1.msra.mxu1 %v188_v19  ;;  %v183_v29 = vld [vmem:[#allocation3 + $0x198] sm:$0xff]  ;;  %v55_v30 = vld [vmem:[#allocation3 + $0x80] sm:$0xff]  ;;  %v182_v31 = vld [vmem:[#allocation3 + $0x190] sm:$0xff] }
  0x19   :  { %100 = vmatprep.subr.mxu0 %v60_v20  ;;  %227 = vmatprep.subr.mxu1 %v187_v21  ;;  %v54_v32 = vld [vmem:[#allocation3 + $0x78] sm:$0xff]  ;;  %v181_v33 = vld [vmem:[#allocation3 + $0x188] sm:$0xff]  ;;  %v53_v34 = vld [vmem:[#allocation3 + $0x70] sm:$0xff] }
  0x1a   :  { %101 = vmatpush1.msra.mxu0 %v59_v22  ;;  %228 = vmatpush1.msra.mxu1 %v186_v23  ;;  %v180_v35 = vld [vmem:[#allocation3 + $0x180] sm:$0xff]  ;;  %v52_v36 = vld [vmem:[#allocation3 + $0x68] sm:$0xff]  ;;  %v179_v37 = vld [vmem:[#allocation3 + $0x178] sm:$0xff] }
  0x1b   :  { %102 = vmatprep.subr.mxu0 %v58_v24  ;;  %229 = vmatprep.subr.mxu1 %v185_v25  ;;  %v51_v38 = vld [vmem:[#allocation3 + $0x60] sm:$0xff]  ;;  %v178_v39 = vld [vmem:[#allocation3 + $0x170] sm:$0xff]  ;;  %v50_v40 = vld [vmem:[#allocation3 + $0x58] sm:$0xff] }
  0x1c   :  { %103 = vmatpush1.msra.mxu0 %v57_v26  ;;  %230 = vmatpush1.msra.mxu1 %v184_v27  ;;  %v177_v41 = vld [vmem:[#allocation3 + $0x168] sm:$0xff]  ;;  %v49_v42 = vld [vmem:[#allocation3 + $0x50] sm:$0xff]  ;;  %v176_v43 = vld [vmem:[#allocation3 + $0x160] sm:$0xff] }
  0x1d   :  { %104 = vmatprep.subr.mxu0 %v56_v28  ;;  %231 = vmatprep.subr.mxu1 %v183_v29  ;;  %v48_v44 = vld [vmem:[#allocation3 + $0x48] sm:$0xff]  ;;  %v175_v45 = vld [vmem:[#allocation3 + $0x158] sm:$0xff]  ;;  %v47_v46 = vld [vmem:[#allocation3 + $0x40] sm:$0xff] }
  0x1e   :  { %105 = vmatpush1.msra.mxu0 %v55_v30  ;;  %232 = vmatpush1.msra.mxu1 %v182_v31  ;;  %v174_v47 = vld [vmem:[#allocation3 + $0x150] sm:$0xff]  ;;  %v46_v48 = vld [vmem:[#allocation3 + $0x38] sm:$0xff]  ;;  %v173_v49 = vld [vmem:[#allocation3 + $0x148] sm:$0xff] }
  0x1f   :  { %106 = vmatprep.subr.mxu0 %v54_v32  ;;  %233 = vmatprep.subr.mxu1 %v181_v33  ;;  %v45_v50 = vld [vmem:[#allocation3 + $0x30] sm:$0xff]  ;;  %v172_v51 = vld [vmem:[#allocation3 + $0x140] sm:$0xff]  ;;  %v44_v52 = vld [vmem:[#allocation3 + $0x28] sm:$0xff] }
  0x20   :  { %107 = vmatpush1.msra.mxu0 %v53_v34  ;;  %234 = vmatpush1.msra.mxu1 %v180_v35  ;;  %v171_v53 = vld [vmem:[#allocation3 + $0x138] sm:$0xff]  ;;  %v43_v54 = vld [vmem:[#allocation3 + $0x20] sm:$0xff]  ;;  %v170_v55 = vld [vmem:[#allocation3 + $0x130] sm:$0xff] }
  0x21   :  { %108 = vmatprep.subr.mxu0 %v52_v36  ;;  %235 = vmatprep.subr.mxu1 %v179_v37  ;;  %v42_v56 = vld [vmem:[#allocation3 + $0x18] sm:$0xff]  ;;  %v169_v57 = vld [vmem:[#allocation3 + $0x128] sm:$0xff]  ;;  %v41_v58 = vld [vmem:[#allocation3 + $0x10] sm:$0xff] }
  0x22   :  { %109 = vmatpush1.msra.mxu0 %v51_v38  ;;  %236 = vmatpush1.msra.mxu1 %v178_v39  ;;  %v168_v59 = vld [vmem:[#allocation3 + $0x120] sm:$0xff]  ;;  %v40_v61 = vld [vmem:[#allocation3 + $0x8] sm:$0xff]  ;;  %v167_v62 = vld [vmem:[#allocation3 + $0x118] sm:$0xff] }
  0x23   :  { %110 = vmatprep.subr.mxu0 %v50_v40  ;;  %237 = vmatprep.subr.mxu1 %v177_v41  ;;  %v38_v60 = vld [vmem:[%s844_s0] sm:$0xff]  ;;  %v566_v63 = vld [vmem:[%s844_s0 + $0x8] sm:$0xff]  ;;  %v166_v1 = vld [vmem:[#allocation3 + $0x110] sm:$0xff] }
  0x24   :  { %111 = vmatpush1.msra.mxu0 %v49_v42  ;;  %238 = vmatpush1.msra.mxu1 %v176_v43  ;;  %v39_v0 = vld [vmem:[#allocation3] sm:$0xff]  ;;  %v72_v2 = vld [vmem:[#allocation3 + $0x108] sm:$0xff]  ;;  %v199_v3 = vld [vmem:[#allocation3 + $0x218] sm:$0xff]  ;;  %v86_v4 = vcombine.high %v38_v60, %v38_v60  ;;  %v214_v6 = vcombine.high %v566_v63, %v566_v63 }
  0x25   :  { %112 = vmatprep.subr.mxu0 %v48_v44  ;;  %239 = vmatprep.subr.mxu1 %v175_v45  ;;  %v71_v5 = vld [vmem:[#allocation3 + $0x100] sm:$0xff]  ;;  %v198_v7 = vld [vmem:[#allocation3 + $0x210] sm:$0xff]  ;;  %v330_v8 = vld [vmem:[#allocation3 + $0x318] sm:$0xff] }
  0x26   :  { %113 = vmatpush1.msra.mxu0 %v47_v46  ;;  %240 = vmatpush1.msra.mxu1 %v174_v47  ;;  %v717_v9 = vld [vmem:[%s844_s0 + $0x10] sm:$0xff]  ;;  %v458_v12 = vld [vmem:[%s847_s3 + $0xf8] sm:$0xff]  ;;  %v328_v13 = vld [vmem:[#allocation3 + $0x308] sm:$0xff] }
  0x27   :  { %114 = vmatprep.subr.mxu0 %v46_v48  ;;  %241 = vmatprep.subr.mxu1 %v173_v49  ;;  %v329_v10 = vld [vmem:[#allocation3 + $0x310] sm:$0xff]  ;;  %v347_v11 = vcombine.high %v717_v9, %v717_v9  ;;  %v442_v14 = vld [vmem:[%s847_s3 + $0x78] sm:$0xff]  ;;  %v327_v15 = vld [vmem:[#allocation3 + $0x300] sm:$0xff] }
  0x28   :  { %115 = vmatpush1.msra.mxu0 %v45_v50  ;;  %242 = vmatpush1.msra.mxu1 %v172_v51  ;;  %v457_v16 = vld [vmem:[%s847_s3 + $0xf0] sm:$0xff]  ;;  %v326_v17 = vld [vmem:[#allocation3 + $0x2f8] sm:$0xff]  ;;  %v456_v20 = vld [vmem:[%s847_s3 + $0xe8] sm:$0xff] }
  0x29   :  { %116 = vmatprep.subr.mxu0 %v44_v52  ;;  %243 = vmatprep.subr.mxu1 %v171_v53  ;;  %v441_v18 = vld [vmem:[%s847_s3 + $0x70] sm:$0xff]  ;;  %v324_v21 = vld [vmem:[#allocation3 + $0x2e8] sm:$0xff]  ;;  %v323_v23 = vld [vmem:[#allocation3 + $0x2e0] sm:$0xff] }
  0x2a   :  { %117 = vmatpush1.msra.mxu0 %v43_v54  ;;  %244 = vmatpush1.msra.mxu1 %v170_v55  ;;  %v325_v19 = vld [vmem:[#allocation3 + $0x2f0] sm:$0xff]  ;;  %v440_v22 = vld [vmem:[%s847_s3 + $0x68] sm:$0xff]  ;;  %v455_v24 = vld [vmem:[%s847_s3 + $0xe0] sm:$0xff] }
  0x2b   :  { %118 = vmatprep.subr.mxu0 %v42_v56  ;;  %245 = vmatprep.subr.mxu1 %v169_v57  ;;  %v322_v25 = vld [vmem:[#allocation3 + $0x2d8] sm:$0xff]  ;;  %v439_v26 = vld [vmem:[%s847_s3 + $0x60] sm:$0xff]  ;;  %v321_v27 = vld [vmem:[#allocation3 + $0x2d0] sm:$0xff] }
  0x2c   :  { %119 = vmatpush1.msra.mxu0 %v41_v58  ;;  %246 = vmatpush1.msra.mxu1 %v168_v59  ;;  %v454_v28 = vld [vmem:[%s847_s3 + $0xd8] sm:$0xff]  ;;  %v320_v29 = vld [vmem:[#allocation3 + $0x2c8] sm:$0xff]  ;;  %v319_v31 = vld [vmem:[#allocation3 + $0x2c0] sm:$0xff] }
  0x2d   :  { %120 = vmatprep.subr.mxu0 %v40_v61  ;;  %247 = vmatprep.subr.mxu1 %v167_v62  ;;  %v438_v30 = vld [vmem:[%s847_s3 + $0x58] sm:$0xff]  ;;  %v453_v32 = vld [vmem:[%s847_s3 + $0xd0] sm:$0xff]  ;;  %v452_v36 = vld [vmem:[%s847_s3 + $0xc8] sm:$0xff] }
  0x2e   :  { %121 = vmatpush1.msra.mxu0 %v39_v0  ;;  %248 = vmatpush1.msra.mxu1 %v166_v1  ;;  %v318_v33 = vld [vmem:[#allocation3 + $0x2b8] sm:$0xff]  ;;  %v437_v34 = vld [vmem:[%s847_s3 + $0x50] sm:$0xff]  ;;  %v316_v37 = vld [vmem:[#allocation3 + $0x2a8] sm:$0xff] }
  0x2f   :  { %152 = vmatprep.subr.mxu0 %v72_v2  ;;  %279 = vmatprep.subr.mxu1 %v199_v3  ;;  %v317_v35 = vld [vmem:[#allocation3 + $0x2b0] sm:$0xff]  ;;  %v436_v38 = vld [vmem:[%s847_s3 + $0x48] sm:$0xff]  ;;  %v315_v39 = vld [vmem:[#allocation3 + $0x2a0] sm:$0xff] }
  0x30   :  { %153 = vmatpush2.msra.mxu0 %v71_v5  ;;  %565 = vmatprep.mubr.msk.f32.mxu0 %vm87_vm0, %v86_v4  ;;  %v451_v40 = vld [vmem:[%s847_s3 + $0xc0] sm:$0xff]  ;;  %v314_v41 = vld [vmem:[#allocation3 + $0x298] sm:$0xff]  ;;  %v313_v43 = vld [vmem:[#allocation3 + $0x290] sm:$0xff] }
  0x31   :  { %280 = vmatpush2.msra.mxu1 %v198_v7  ;;  %568 = vmatprep.mubr.msk.f32.mxu1 %vm87_vm0, %v214_v6  ;;  %v435_v42 = vld [vmem:[%s847_s3 + $0x40] sm:$0xff]  ;;  %v312_v44 = vld [vmem:[#allocation3 + $0x288] sm:$0xff]  ;;  %v310_v46 = vld [vmem:[#allocation3 + $0x278] sm:$0xff] }
  0x32   :  { %155 = vmatmul.mubr.f32.vlgmr.msra.gmra.mxu0 %v38_v60  ;;  %282 = vmatmul.mubr.f32.vlgmr.msra.gmra.mxu1 %v566_v63  ;;  %v311_v45 = vld [vmem:[#allocation3 + $0x280] sm:$0xff]  ;;  %v309_v47 = vld [vmem:[#allocation3 + $0x270] sm:$0xff]  ;;  %v308_v48 = vld [vmem:[#allocation3 + $0x268] sm:$0xff] }
  0x33   :  { %350 = vmatprep.subr.mxu0 %v330_v8  ;;  %571 = vmatprep.mubr.msk.f32.mxu0 %vm87_vm0, %v347_v11  ;;  %v307_v49 = vld [vmem:[#allocation3 + $0x260] sm:$0xff]  ;;  %v306_v50 = vld [vmem:[#allocation3 + $0x258] sm:$0xff]  ;;  %v305_v51 = vld [vmem:[#allocation3 + $0x250] sm:$0xff] }
  0x34   :  { %351 = vmatpush1.msra.mxu0 %v329_v10  ;;  %572 = vmatprep.subr.mxu1 %v458_v12  ;;  %v304_v52 = vld [vmem:[#allocation3 + $0x248] sm:$0xff]  ;;  %v303_v53 = vld [vmem:[#allocation3 + $0x240] sm:$0xff]  ;;  %v302_v54 = vld [vmem:[#allocation3 + $0x238] sm:$0xff]  ;;  %v75_v12 = vlaneseq }
  0x35   :  { %352 = vmatprep.subr.mxu0 %v328_v13  ;;  %573 = vmatpush3.msra.mxu1 %v442_v14  ;;  %v301_v55 = vld [vmem:[#allocation3 + $0x230] sm:$0xff]  ;;  %v300_v56 = vld [vmem:[#allocation3 + $0x228] sm:$0xff]  ;;  %v299_v57 = vld [vmem:[#allocation3 + $0x220] sm:$0xff] }
  0x36   :  { %353 = vmatpush1.msra.mxu0 %v327_v15  ;;  %574 = vmatprep.subr.mxu1 %v457_v16  ;;  %v332_v58 = vld [vmem:[#allocation3 + $0x328] sm:$0xff]  ;;  %v331_v59 = vld [vmem:[#allocation3 + $0x320] sm:$0xff]  ;;  %v450_v60 = vld [vmem:[%s847_s3 + $0xb8] sm:$0xff]  ;;  %v76_v13 = vshrl.u32 %v75_v12, 7 }
  0x37   :  { %354 = vmatprep.subr.mxu0 %v326_v17  ;;  %575 = vmatpush3.msra.mxu1 %v441_v18  ;;  %v434_v61 = vld [vmem:[%s847_s3 + $0x38] sm:$0xff]  ;;  %v449_v62 = vld [vmem:[%s847_s3 + $0xb0] sm:$0xff]  ;;  %v448_v0 = vld [vmem:[%s847_s3 + $0xa8] sm:$0xff] }
  0x38   :  { %355 = vmatpush1.msra.mxu0 %v325_v19  ;;  %576 = vmatprep.subr.mxu1 %v456_v20  ;;  %v433_v63 = vld [vmem:[%s847_s3 + $0x30] sm:$0xff]  ;;  %v432_v1 = vld [vmem:[%s847_s3 + $0x28] sm:$0xff]  ;;  %v447_v2 = vld [vmem:[%s847_s3 + $0xa0] sm:$0xff]  ;;  %v77_v14 = vsub.s32 0, %v76_v13  ;;  %v81_v17 = vsub.s32 1, %v76_v13 }
  0x39   :  { %356 = vmatprep.subr.mxu0 %v324_v21  ;;  %577 = vmatpush3.msra.mxu1 %v440_v22  ;;  %v431_v3 = vld [vmem:[%s847_s3 + $0x20] sm:$0xff]  ;;  %v446_v4 = vld [vmem:[%s847_s3 + $0x98] sm:$0xff]  ;;  %v445_v6 = vld [vmem:[%s847_s3 + $0x90] sm:$0xff] }
  0x3a   :  { %357 = vmatpush1.msra.mxu0 %v323_v23  ;;  %578 = vmatprep.subr.mxu1 %v455_v24  ;;  %v430_v5 = vld [vmem:[%s847_s3 + $0x18] sm:$0xff]  ;;  %v429_v7 = vld [vmem:[%s847_s3 + $0x10] sm:$0xff]  ;;  %v444_v8 = vld [vmem:[%s847_s3 + $0x88] sm:$0xff] }
  0x3b   :  { %358 = vmatprep.subr.mxu0 %v322_v25  ;;  %579 = vmatpush3.msra.mxu1 %v439_v26  ;;  %v443_v10 = vld [vmem:[%s847_s3 + $0x80] sm:$0xff] }
  0x3c   :  { %359 = vmatpush1.msra.mxu0 %v321_v27  ;;  %580 = vmatprep.subr.mxu1 %v454_v28  ;;  %v427_v11 = vld [vmem:[%s847_s3] sm:$0xff] }
  0x3d   :  { %360 = vmatprep.subr.mxu0 %v320_v29  ;;  %581 = vmatpush3.msra.mxu1 %v438_v30  ;;  %v73_v15 = vld [vmem:[%s846_s2] sm:$0x3]  ;;  %v567_v16 = vld [vmem:[%s846_s2 + $0x2] sm:$0x3] }
  0x3e   :  { %361 = vmatpush1.msra.mxu0 %v319_v31  ;;  %582 = vmatprep.subr.mxu1 %v453_v32  ;;  %v78_v18 = vrot.slane %v73_v15, %v77_v14  ;;  %v206_v19 = vrot.slane %v567_v16, %v77_v14  ;;  %v82_v20 = vrot.slane %v73_v15, %v81_v17 }
  0x3f   :  { %362 = vmatprep.subr.mxu0 %v318_v33  ;;  %583 = vmatpush3.msra.mxu1 %v437_v34  ;;  %v210_v21 = vrot.slane %v567_v16, %v81_v17  ;;  %v570_v34 = vld [vmem:[%s846_s2 + $0x4] sm:$0x3] }
  0x40   :  { %363 = vmatpush1.msra.mxu0 %v317_v35  ;;  %584 = vmatprep.subr.mxu1 %v452_v36  ;;  %v339_v35 = vrot.slane %v570_v34, %v77_v14  ;;  %v343_v36 = vrot.slane %v570_v34, %v81_v17 }
  0x41   :  { %364 = vmatprep.subr.mxu0 %v316_v37  ;;  %585 = vmatpush3.msra.mxu1 %v436_v38 }
  0x42   :  { %365 = vmatpush1.msra.mxu0 %v315_v39  ;;  %586 = vmatprep.subr.mxu1 %v451_v40 }
  0x43   :  { %366 = vmatprep.subr.mxu0 %v314_v41  ;;  %587 = vmatpush3.msra.mxu1 %v435_v42 }
  0x44   :  { %367 = vmatpush1.msra.mxu0 %v313_v43  ;;  %588 = vmatprep.subr.mxu1 %v450_v60 }
  0x45   :  { %368 = vmatprep.subr.mxu0 %v312_v44  ;;  %589 = vmatpush3.msra.mxu1 %v434_v61 }
  0x46   :  { %369 = vmatpush1.msra.mxu0 %v311_v45  ;;  %590 = vmatprep.subr.mxu1 %v449_v62  ;;  %v534_v45 = vld [vmem:[%s848_s4] sm:$0xff] }
  0x47   :  { %370 = vmatprep.subr.mxu0 %v310_v46  ;;  %591 = vmatpush3.msra.mxu1 %v433_v63 }
  0x48   :  { %371 = vmatpush1.msra.mxu0 %v309_v47  ;;  %592 = vmatprep.subr.mxu1 %v448_v0  ;;  %v538_v47 = vld [vmem:[%s849_s5] sm:$0xff] }
  0x49   :  { %372 = vmatprep.subr.mxu0 %v308_v48  ;;  %593 = vmatpush3.msra.mxu1 %v432_v1 }
  0x4a   :  { %373 = vmatpush1.msra.mxu0 %v307_v49  ;;  %594 = vmatprep.subr.mxu1 %v447_v2 }
  0x4b   :  { %374 = vmatprep.subr.mxu0 %v306_v50  ;;  %595 = vmatpush3.msra.mxu1 %v431_v3 }
  0x4c   :  { %375 = vmatpush1.msra.mxu0 %v305_v51  ;;  %596 = vmatprep.subr.mxu1 %v446_v4 }
  0x4d   :  { %376 = vmatprep.subr.mxu0 %v304_v52  ;;  %597 = vmatpush3.msra.mxu1 %v430_v5 }
  0x4e   :  { %377 = vmatpush1.msra.mxu0 %v303_v53  ;;  %598 = vmatprep.subr.mxu1 %v445_v6  ;;  %v535_v53 = vld [vmem:[%s848_s4 + $0x8] sm:$0xf] }
  0x4f   :  { %378 = vmatprep.subr.mxu0 %v302_v54  ;;  %599 = vmatpush3.msra.mxu1 %v429_v7 }
  0x50   :  { %379 = vmatpush1.msra.mxu0 %v301_v55  ;;  %600 = vmatprep.subr.mxu1 %v444_v8  ;;  %v539_v55 = vld [vmem:[%s849_s5 + $0x8] sm:$0xf] }
  0x51   :  { %380 = vmatprep.subr.mxu0 %v300_v56 }
  0x52   :  { %381 = vmatpush1.msra.mxu0 %v299_v57 }
  0x53   :  { %412 = vmatprep.subr.mxu0 %v332_v58 }
  0x54   :  { %413 = vmatpush2.msra.mxu0 %v331_v59 }
  0x55   :  { %415 = vmatmul.mubr.f32.vlgmr.msra.gmra.mxu0 %v717_v9  ;;  %v428_v9 = vld [vmem:[%s847_s3 + $0x8] sm:$0xff] }
  0x56   :  { %601 = vmatpush3.msra.mxu1 %v428_v9 }
  0x57   :  { %602 = vmatprep.subr.mxu1 %v443_v10 }
  0x58   :  { %603 = vmatpush3.msra.mxu1 %v427_v11 }
  0xf2   :  { %v156_v22 = vpop.f32.mrf.mxu0  ;;  %v283_v23 = vpop.f32.mrf.mxu1 }
  0xf3   :  { %v157_v24 = vadd.f32 %v156_v22, %v78_v18  ;;  %v284_v25 = vadd.f32 %v283_v23, %v206_v19 }
  0xf4   :  { %v158_v26 = vpop.f32.mrf.mxu0  ;;  %v285_v27 = vpop.f32.mrf.mxu1 }
  0xf5   :  { %161 = vst [vmem:[#allocation2 + $0x10] sm:$0xf] %v157_v24  ;;  %v290_v28 = vrot.slane %v284_v25, 4  ;;  %v159_v29 = vadd.f32 %v158_v26, %v82_v20  ;;  %v286_v30 = vadd.f32 %v285_v27, %v210_v21 }
  0xf7   :  { %294 = vst [vmem:[#allocation2 + $0x10] sm:$0xf0] %v290_v28  ;;  %162 = vst [vmem:[#allocation2] sm:$0xf] %v159_v29  ;;  %v291_v31 = vrot.slane %v286_v30, 4 }
  0xf9   :  { %295 = vst [vmem:[#allocation2] sm:$0xf0] %v291_v31 }
  0xfe   :  { %v423_v33 = vld [vmem:[#allocation2 + $0x10] sm:$0xff] }
 0x100   :  { %v424_v32 = vld [vmem:[#allocation2] sm:$0xff] }
 0x101   :  { %523 = vmatprep.mubr.f32.mxu1 %v424_v32 }
 0x102   :  { %524 = vmatmul.mubr.f32.vlgmr.msra.gmra.mxu1 %v423_v33 }
 0x115   :  { %v416_v37 = vpop.f32.mrf.mxu0 }
 0x116   :  { %v417_v38 = vadd.f32 %v416_v37, %v339_v35 }
 0x117   :  { %v418_v39 = vpop.f32.mrf.mxu0 }
 0x118   :  { %421 = vst [vmem:[#allocation2 + $0x18] sm:$0xf] %v417_v38  ;;  %v419_v40 = vadd.f32 %v418_v39, %v343_v36 }
 0x11a   :  { %422 = vst [vmem:[#allocation2 + $0x8] sm:$0xf] %v419_v40 }
 0x11f   :  { %v425_v42 = vld [vmem:[#allocation2 + $0x18] sm:$0xf] }
 0x121   :  { %v426_v41 = vld [vmem:[#allocation2 + $0x8] sm:$0xf] }
 0x122   :  { %528 = vmatprep.mubr.f32.mxu1 %v426_v41 }
 0x123   :  { %529 = vmatmul.mubr.f32.gmra.mxu1 %v425_v42 }
 0x1c2   :  { %v604_v43 = vpop.f32.mrf.mxu1 }
 0x1c4   :  { %v605_v44 = vpop.f32.mrf.mxu1 }
 0x1c5   :  { %v606_v46 = vadd.f32 %v605_v44, %v604_v43 }
 0x1c7   :  { %v536_v48 = vmul.f32 %v606_v46, %v534_v45 }
 0x1c9   :  { %v540_v49 = vadd.f32 %v538_v47, %v536_v48 }
 0x1cb   :  { %v542_v50 = vmax.f32 %v540_v49, 0.0 }
 0x1cd   :  { %545 = vst.msk [vmem:[#allocation6] sm:$0xff] %vm544_vm1, %v542_v50 }
 0x1e3   :  { %v607_v51 = vpop.f32.mrf.mxu1 }
 0x1e5   :  { %v608_v52 = vpop.f32.mrf.mxu1 }
 0x1e6   :  { %v609_v54 = vadd.f32 %v608_v52, %v607_v51 }
 0x1e8   :  { %v537_v56 = vmul.f32 %v609_v54, %v535_v53 }
 0x1ea   :  { %v541_v57 = vadd.f32 %v539_v55, %v537_v56 }
 0x1ec   :  { %v543_v58 = vmax.f32 %v541_v57, 0.0 }
 0x1ee   :  { %547 = vst.msk [vmem:[#allocation6 + $0x8] sm:$0xf] %vm546_vm2, %v543_v58 }
 0x1ef   :  { %650 = shalt.err (!%p647_p9)
}
 0x1f0   :  { %s667_s4 = smov 128   ;;  %s668_s10 = smov 8  }
 0x1f1   :  { %559 = dma.vmem_to_hbm [thread:$0]  %s554_s8, 256, %s850_s6, [#allocation5], %s667_s4, %s667_s4, %s668_s10  }
 0x1f2   :  { %661 = dma.done.wait [#allocation5], 256  }
 0x1f3   :  { %662 = vsyncadd [#allocation5], 4294967040 }
 0x1f4   :  { %563 = vsyncpa [#allocation4], 1 }
 0x1f5   :  { %564 = vsyncpa [#allocation5], 1 }

</bundles_post_ra>
